<compile_context>
chip_gen: v6e
topology: v6e:2x2x1
jax: 0.10.0
libtpu: 0.0.40
codegen_flags: <defaults>
</compile_context>

<pallas_src>
import functools

import jax
import jax.numpy as jnp
from jax import lax
from jax.experimental import pallas as pl
from jax.experimental.pallas import tpu as pltpu

_BIG = 1e30  # stand-in for +inf (avoids NaN from inf - inf)


def _round_up(a, b):
    return (a + b - 1) // b * b


def _fp_kernel(k, n_src,
               x_ref, neg2_pos_t_ref, p_sq_ref, batch_row_ref,
               x_skip_ref, ps_ref, ps_sq_ref, batch_col_ref,
               w1a_ref, w1b_ref, b1_ref, w2_ref, b2_ref, s2_ref, t2_ref,
               out_ref):
    ps = ps_ref[...]                                    # [tm, Dp]  (f32)
    tm = ps.shape[0]

    # --- pairwise squared distances (the -2 is folded into neg2_pos_t) ------
    cross = jnp.dot(ps, neg2_pos_t_ref[...],
                    preferred_element_type=jnp.float32)              # [tm, N]
    d2 = jnp.maximum(ps_sq_ref[...] + p_sq_ref[...] + cross, 0.0)
    # restrict neighbours to the same batch element
    d2 = jnp.where(batch_col_ref[...] == batch_row_ref[...], d2, _BIG)

    # --- k-NN selection: packed (distance, column) key, 1 reduction / iter --
    # bitcast(d2, int32) is order-preserving for d2 >= 0; low idx_bits carry
    # the column index (tie-break + argmin recovery in a single min).
    idx_bits = max((n_src - 1).bit_length(), 1)
    lo_mask = (1 << idx_bits) - 1
    hi_mask = jnp.int32(~lo_mask)
    col_iota = lax.broadcasted_iota(jnp.int32, (1, n_src), 1)        # [1, N]
    key = (pltpu.bitcast(d2, jnp.int32) & hi_mask) | col_iota        # [tm, N]

    wmat = jnp.zeros((tm, n_src), jnp.float32)
    den = jnp.zeros((tm, 1), jnp.float32)
    int_big = jnp.int32(0x7FFFFFFF)
    # k is a small static Python int; switch to lax.fori_loop(unroll=True)
    # with a (key, wmat, den) carry if k ever becomes large / dynamic.
    for _ in range(k):
        min_key = jnp.min(key, axis=-1, keepdims=True)               # [tm, 1]
        sel_col = min_key & jnp.int32(lo_mask)                       # argmin
        d2_sel = pltpu.bitcast(min_key & hi_mask, jnp.float32)       # ~exact d2
        w = 1.0 / jnp.maximum(d2_sel, 1e-16)                         # [tm, 1]
        onehot = col_iota == sel_col                                 # [tm, N]
        wmat = jnp.where(onehot, w, wmat)                            # unique col
        den = den + w
        key = jnp.where(onehot, int_big, key)                        # remove sel

    # --- inverse-distance interpolation (dense weight matrix on the MXU) ----
    num = jnp.dot(wmat, x_ref[...], preferred_element_type=jnp.float32)
    y = num * pl.reciprocal(den, approx=True)                        # [tm, C_in]

    # --- concat([y, x_skip]) @ W1 == split matmul; BN1 folded into W2/b2 ----
    h = (jnp.dot(y.astype(jnp.bfloat16), w1a_ref[...],
                 preferred_element_type=jnp.float32)
         + jnp.dot(x_skip_ref[...].astype(jnp.bfloat16), w1b_ref[...],
                   preferred_element_type=jnp.float32)
         + b1_ref[...])
    h = jnp.maximum(h, 0.0)                                          # ReLU
    h = jnp.dot(h.astype(jnp.bfloat16), w2_ref[...],
                preferred_element_type=jnp.float32) + b2_ref[...]
    h = jnp.maximum(h, 0.0)                                          # ReLU
    h = h * s2_ref[...] + t2_ref[...]                                # folded BN2
    out_ref[...] = h.astype(out_ref.dtype)


def fp_module_forward(params, k, x, pos, batch, x_skip, pos_skip, batch_skip,
                      *, tm=256):
    """FPModule.forward: (self.nn(cat[knn_interp(x), x_skip]), pos_skip, batch_skip)."""
    N, c_in = x.shape
    M, c_skip = x_skip.shape
    D = pos.shape[1]
    Dp = 8  # pad coordinate dim (3) to a sublane-friendly width with zeros

    tm = min(_round_up(tm, 8), _round_up(M, 8))
    M_pad = _round_up(M, tm)
    grid_m = M_pad // tm

    x_f = x.astype(jnp.float32)
    pos_f = pos.astype(jnp.float32)
    pos_skip_f = pos_skip.astype(jnp.float32)

    # source-point side: resident across the whole grid
    neg2_pos_t = jnp.zeros((Dp, N), jnp.float32).at[:D, :].set(-2.0 * pos_f.T)
    p_sq = jnp.sum(pos_f * pos_f, axis=-1).reshape(1, N)
    batch_row = batch.reshape(1, N).astype(jnp.int32)

    # skip-point side: tiled over M (pad rows so tm divides M; padded rows use
    # batch id -1 so they never match a source point and are sliced off below)
    ps_p = jnp.zeros((M_pad, Dp), jnp.float32).at[:M, :D].set(pos_skip_f)
    ps_sq = jnp.sum(ps_p * ps_p, axis=-1, keepdims=True)             # [M_pad, 1]
    x_skip_p = jnp.zeros((M_pad, c_skip), jnp.float32).at[:M].set(
        x_skip.astype(jnp.float32))
    batch_col = jnp.full((M_pad, 1), -1, jnp.int32).at[:M, 0].set(
        batch_skip.astype(jnp.int32))

    # fold eval-mode BatchNorms; fold BN1 into Lin2; pad c_out to 128 lanes
    (w1, b1, g1, be1, rm1, rv1), (w2, b2, g2, be2, rm2, rv2) = params
    eps = 1e-5
    s1 = g1 / jnp.sqrt(rv1 + eps)
    t1 = be1 - rm1 * s1
    s2 = g2 / jnp.sqrt(rv2 + eps)
    t2 = be2 - rm2 * s2

    hidden = w1.shape[1]
    c_out = w2.shape[1]
    c_out_p = _round_up(c_out, 128)

    w1a = w1[:c_in].astype(jnp.bfloat16)           # split of the concat-Linear
    w1b = w1[c_in:].astype(jnp.bfloat16)
    b1p = b1.reshape(1, hidden).astype(jnp.float32)
    w2_fold = s1[:, None] * w2                     # BN1 folded into Lin2
    b2_fold = b2 + t1 @ w2
    w2f = jnp.zeros((hidden, c_out_p), jnp.float32).at[:, :c_out].set(
        w2_fold).astype(jnp.bfloat16)
    b2p = jnp.zeros((1, c_out_p), jnp.float32).at[0, :c_out].set(b2_fold)
    s2p = jnp.zeros((1, c_out_p), jnp.float32).at[0, :c_out].set(s2)
    t2p = jnp.zeros((1, c_out_p), jnp.float32).at[0, :c_out].set(t2)

    full = lambda i: (0, 0)
    rows = lambda i: (i, 0)

    out = pl.pallas_call(
        functools.partial(_fp_kernel, k, N),
        out_shape=jax.ShapeDtypeStruct((M_pad, c_out_p), jnp.float32),
        grid=(grid_m,),
        in_specs=[
            pl.BlockSpec((N, c_in), full),          # x
            pl.BlockSpec((Dp, N), full),            # -2 * pos^T
            pl.BlockSpec((1, N), full),             # |pos|^2
            pl.BlockSpec((1, N), full),             # batch (source)
            pl.BlockSpec((tm, c_skip), rows),       # x_skip
            pl.BlockSpec((tm, Dp), rows),           # pos_skip
            pl.BlockSpec((tm, 1), rows),            # |pos_skip|^2
            pl.BlockSpec((tm, 1), rows),            # batch_skip
            pl.BlockSpec((c_in, hidden), full),     # W1a
            pl.BlockSpec((c_skip, hidden), full),   # W1b
            pl.BlockSpec((1, hidden), full),        # b1
            pl.BlockSpec((hidden, c_out_p), full),  # W2 (BN1-folded, padded)
            pl.BlockSpec((1, c_out_p), full),       # b2
            pl.BlockSpec((1, c_out_p), full),       # s2
            pl.BlockSpec((1, c_out_p), full),       # t2
        ],
        out_specs=pl.BlockSpec((tm, c_out_p), rows),
        compiler_params=pltpu.CompilerParams(
            dimension_semantics=("parallel",),
            vmem_limit_bytes=64 * 1024 * 1024),
    )(x_f, neg2_pos_t, p_sq, batch_row,
      x_skip_p, ps_p, ps_sq, batch_col,
      w1a, w1b, b1p, w2f, b2p, s2p, t2p)

    return out[:M, :c_out], pos_skip, batch_skip


def init_params(key, c_cat, hidden, c_out):
    """Deterministic params for nn = MLP([c_cat, hidden, c_out]) = 2x (Lin, ReLU, BN)."""
    ks = jax.random.split(key, 8)

    def lin(kk, cin, cout):
        w = jax.random.normal(kk, (cin, cout), jnp.float32) * (1.0 / jnp.sqrt(cin))
        b = jnp.linspace(-0.1, 0.1, cout, dtype=jnp.float32)
        return w, b

    def bn(kk, c):
        gamma = 1.0 + 0.1 * jax.random.normal(kk, (c,), jnp.float32)
        beta = jnp.linspace(-0.05, 0.05, c, dtype=jnp.float32)
        rmean = 0.1 * jnp.sin(jnp.arange(c, dtype=jnp.float32))
        rvar = 1.0 + 0.2 * jnp.cos(jnp.arange(c, dtype=jnp.float32)) ** 2
        return gamma, beta, rmean, rvar

    w1, b1 = lin(ks[0], c_cat, hidden)
    g1, be1, rm1, rv1 = bn(ks[1], hidden)
    w2, b2 = lin(ks[2], hidden, c_out)
    g2, be2, rm2, rv2 = bn(ks[3], c_out)
    return ((w1, b1, g1, be1, rm1, rv1), (w2, b2, g2, be2, rm2, rv2))


if __name__ == "__main__":
    key = jax.random.PRNGKey(0)
    k_nn = 3
    N, M = 64, 96           # coarse points (x/pos), fine skip points
    C_IN, C_SKIP = 16, 16   # feature channels before concat
    HIDDEN, C_OUT = 64, 32  # nn = MLP([32, 64, 32])

    kx, kp, kxs, kps, kparam = jax.random.split(key, 5)
    x = jax.random.normal(kx, (N, C_IN), jnp.float32)
    pos = jax.random.uniform(kp, (N, 3), jnp.float32)
    batch = jnp.concatenate(
        [jnp.zeros((N // 2,), jnp.int32), jnp.ones((N // 2,), jnp.int32)])
    x_skip = jax.random.normal(kxs, (M, C_SKIP), jnp.float32)
    pos_skip = jax.random.uniform(kps, (M, 3), jnp.float32)
    batch_skip = jnp.concatenate(
        [jnp.zeros((M // 2,), jnp.int32), jnp.ones((M // 2,), jnp.int32)])

    params = init_params(kparam, C_IN + C_SKIP, HIDDEN, C_OUT)

    # tm=32 -> grid=(3,): exercises the tiled / pipelined path at toy sizes.
    out, pos_out, batch_out = fp_module_forward(
        params, k_nn, x, pos, batch, x_skip, pos_skip, batch_skip, tm=32)
    jax.block_until_ready(out)
    assert out.shape == (M, C_OUT)
    assert bool(jnp.all(jnp.isfinite(out)))
    print("KERNEL_OK")
</pallas_src>

<mosaic_0001>
module attributes {stable_mosaic.version = 11 : i64} {
  func.func @_fp_kernel(%arg0: i32, %arg1: memref<64x16xf32, #tpu.memory_space<vmem>>, %arg2: memref<8x64xf32, #tpu.memory_space<vmem>>, %arg3: memref<1x64xf32, #tpu.memory_space<vmem>>, %arg4: memref<1x64xi32, #tpu.memory_space<vmem>>, %arg5: memref<32x16xf32, #tpu.memory_space<vmem>>, %arg6: memref<32x8xf32, #tpu.memory_space<vmem>>, %arg7: memref<32x1xf32, #tpu.memory_space<vmem>>, %arg8: memref<32x1xi32, #tpu.memory_space<vmem>>, %arg9: memref<16x64xbf16, #tpu.memory_space<vmem>>, %arg10: memref<16x64xbf16, #tpu.memory_space<vmem>>, %arg11: memref<1x64xf32, #tpu.memory_space<vmem>>, %arg12: memref<64x128xbf16, #tpu.memory_space<vmem>>, %arg13: memref<1x128xf32, #tpu.memory_space<vmem>>, %arg14: memref<1x128xf32, #tpu.memory_space<vmem>>, %arg15: memref<1x128xf32, #tpu.memory_space<vmem>>, %arg16: memref<32x128xf32, #tpu.memory_space<vmem>>) attributes {dimension_semantics = [#tpu.dimension_semantics<parallel>], iteration_bounds = array<i64: 3>, scalar_prefetch = 0 : i64, scratch_operands = 0 : i64, tpu.core_type = #tpu.core_type<tc>, window_params = [{pipeline_mode = #tpu.pipeline_mode<synchronous>, transform_indices = @transform_0, window_bounds = array<i64: 64, 16>}, {pipeline_mode = #tpu.pipeline_mode<synchronous>, transform_indices = @transform_1, window_bounds = array<i64: 8, 64>}, {pipeline_mode = #tpu.pipeline_mode<synchronous>, transform_indices = @transform_2, window_bounds = array<i64: 1, 64>}, {pipeline_mode = #tpu.pipeline_mode<synchronous>, transform_indices = @transform_3, window_bounds = array<i64: 1, 64>}, {transform_indices = @transform_4, window_bounds = array<i64: 32, 16>}, {transform_indices = @transform_5, window_bounds = array<i64: 32, 8>}, {transform_indices = @transform_6, window_bounds = array<i64: 32, 1>}, {transform_indices = @transform_7, window_bounds = array<i64: 32, 1>}, {pipeline_mode = #tpu.pipeline_mode<synchronous>, transform_indices = @transform_8, window_bounds = array<i64: 16, 64>}, {pipeline_mode = #tpu.pipeline_mode<synchronous>, transform_indices = @transform_9, window_bounds = array<i64: 16, 64>}, {pipeline_mode = #tpu.pipeline_mode<synchronous>, transform_indices = @transform_10, window_bounds = array<i64: 1, 64>}, {pipeline_mode = #tpu.pipeline_mode<synchronous>, transform_indices = @transform_11, window_bounds = array<i64: 64, 128>}, {pipeline_mode = #tpu.pipeline_mode<synchronous>, transform_indices = @transform_12, window_bounds = array<i64: 1, 128>}, {pipeline_mode = #tpu.pipeline_mode<synchronous>, transform_indices = @transform_13, window_bounds = array<i64: 1, 128>}, {pipeline_mode = #tpu.pipeline_mode<synchronous>, transform_indices = @transform_14, window_bounds = array<i64: 1, 128>}, {transform_indices = @transform_15, window_bounds = array<i64: 32, 128>}]} {
    %c0 = arith.constant 0 : index
    %c0_0 = arith.constant 0 : index
    %0 = vector.load %arg6[%c0, %c0_0] : memref<32x8xf32, #tpu.memory_space<vmem>>, vector<32x8xf32>
    %c0_1 = arith.constant 0 : index
    %c0_2 = arith.constant 0 : index
    %1 = vector.load %arg2[%c0_1, %c0_2] : memref<8x64xf32, #tpu.memory_space<vmem>>, vector<8x64xf32>
    %cst = arith.constant dense<0.000000e+00> : vector<32x64xf32>
    %2 = tpu.matmul %0, %1, %cst {dimension_numbers = #tpu.dot_dimension_numbers<[1], [0], [0], [1], [0, 0, 1, 1], [], []>} : vector<32x8xf32>, vector<8x64xf32>, vector<32x64xf32> -> vector<32x64xf32>
    %c0_3 = arith.constant 0 : index
    %c0_4 = arith.constant 0 : index
    %3 = vector.load %arg7[%c0_3, %c0_4] : memref<32x1xf32, #tpu.memory_space<vmem>>, vector<32x1xf32>
    %c0_5 = arith.constant 0 : index
    %c0_6 = arith.constant 0 : index
    %4 = vector.load %arg3[%c0_5, %c0_6] : memref<1x64xf32, #tpu.memory_space<vmem>>, vector<1x64xf32>
    %5 = vector.broadcast %3 : vector<32x1xf32> to vector<32x64xf32>
    %6 = vector.broadcast %4 : vector<1x64xf32> to vector<32x64xf32>
    %7 = arith.addf %5, %6 : vector<32x64xf32>
    %8 = arith.addf %7, %2 : vector<32x64xf32>
    %cst_7 = arith.constant 0.000000e+00 : f32
    %9 = vector.broadcast %cst_7 : f32 to vector<32x64xf32>
    %10 = arith.maximumf %8, %9 : vector<32x64xf32>
    %c0_8 = arith.constant 0 : index
    %c0_9 = arith.constant 0 : index
    %11 = vector.load %arg8[%c0_8, %c0_9] : memref<32x1xi32, #tpu.memory_space<vmem>>, vector<32x1xi32>
    %c0_10 = arith.constant 0 : index
    %c0_11 = arith.constant 0 : index
    %12 = vector.load %arg4[%c0_10, %c0_11] : memref<1x64xi32, #tpu.memory_space<vmem>>, vector<1x64xi32>
    %13 = vector.broadcast %11 : vector<32x1xi32> to vector<32x64xi32>
    %14 = vector.broadcast %12 : vector<1x64xi32> to vector<32x64xi32>
    %15 = arith.cmpi eq, %13, %14 : vector<32x64xi32>
    %cst_12 = arith.constant 1.000000e+30 : f32
    %16 = vector.broadcast %cst_12 : f32 to vector<32x64xf32>
    %17 = arith.select %15, %10, %16 : vector<32x64xi1>, vector<32x64xf32>
    %18 = tpu.iota {dimensions = array<i32: 1>} : vector<1x64xi32>
    %19 = tpu.bitcast %17 : vector<32x64xf32> -> vector<32x64xi32>
    %c-64_i32 = arith.constant -64 : i32
    %20 = vector.broadcast %c-64_i32 : i32 to vector<32x64xi32>
    %21 = arith.andi %19, %20 : vector<32x64xi32>
    %22 = vector.broadcast %18 : vector<1x64xi32> to vector<32x64xi32>
    %23 = arith.ori %21, %22 : vector<32x64xi32>
    %cst_13 = arith.constant 0.000000e+00 : f32
    %24 = vector.broadcast %cst_13 : f32 to vector<32x64xf32>
    %cst_14 = arith.constant 0.000000e+00 : f32
    %25 = vector.broadcast %cst_14 : f32 to vector<32x1xf32>
    %cst_15 = arith.constant dense<2147483647> : vector<32xi32>
    %26 = vector.multi_reduction <minsi>, %23, %cst_15 [1] : vector<32x64xi32> to vector<32xi32>
    %27 = vector.shape_cast %26 : vector<32xi32> to vector<32x1xi32>
    %c63_i32 = arith.constant 63 : i32
    %28 = vector.broadcast %c63_i32 : i32 to vector<32x1xi32>
    %29 = arith.andi %27, %28 : vector<32x1xi32>
    %c-64_i32_16 = arith.constant -64 : i32
    %30 = vector.broadcast %c-64_i32_16 : i32 to vector<32x1xi32>
    %31 = arith.andi %27, %30 : vector<32x1xi32>
    %32 = tpu.bitcast %31 : vector<32x1xi32> -> vector<32x1xf32>
    %cst_17 = arith.constant 1.000000e-16 : f32
    %33 = vector.broadcast %cst_17 : f32 to vector<32x1xf32>
    %34 = arith.maximumf %32, %33 : vector<32x1xf32>
    %cst_18 = arith.constant 1.000000e+00 : f32
    %35 = vector.broadcast %cst_18 : f32 to vector<32x1xf32>
    %36 = arith.divf %35, %34 : vector<32x1xf32>
    %37 = vector.broadcast %18 : vector<1x64xi32> to vector<32x64xi32>
    %38 = vector.broadcast %29 : vector<32x1xi32> to vector<32x64xi32>
    %39 = arith.cmpi eq, %37, %38 : vector<32x64xi32>
    %40 = vector.shape_cast %36 : vector<32x1xf32> to vector<32x1xf32>
    %41 = vector.broadcast %40 : vector<32x1xf32> to vector<32x64xf32>
    %42 = arith.select %39, %41, %24 : vector<32x64xi1>, vector<32x64xf32>
    %43 = arith.addf %25, %36 : vector<32x1xf32>
    %c2147483647_i32 = arith.constant 2147483647 : i32
    %44 = vector.broadcast %c2147483647_i32 : i32 to vector<32x64xi32>
    %45 = arith.select %39, %44, %23 : vector<32x64xi1>, vector<32x64xi32>
    %cst_19 = arith.constant dense<2147483647> : vector<32xi32>
    %46 = vector.multi_reduction <minsi>, %45, %cst_19 [1] : vector<32x64xi32> to vector<32xi32>
    %47 = vector.shape_cast %46 : vector<32xi32> to vector<32x1xi32>
    %c63_i32_20 = arith.constant 63 : i32
    %48 = vector.broadcast %c63_i32_20 : i32 to vector<32x1xi32>
    %49 = arith.andi %47, %48 : vector<32x1xi32>
    %c-64_i32_21 = arith.constant -64 : i32
    %50 = vector.broadcast %c-64_i32_21 : i32 to vector<32x1xi32>
    %51 = arith.andi %47, %50 : vector<32x1xi32>
    %52 = tpu.bitcast %51 : vector<32x1xi32> -> vector<32x1xf32>
    %cst_22 = arith.constant 1.000000e-16 : f32
    %53 = vector.broadcast %cst_22 : f32 to vector<32x1xf32>
    %54 = arith.maximumf %52, %53 : vector<32x1xf32>
    %cst_23 = arith.constant 1.000000e+00 : f32
    %55 = vector.broadcast %cst_23 : f32 to vector<32x1xf32>
    %56 = arith.divf %55, %54 : vector<32x1xf32>
    %57 = vector.broadcast %18 : vector<1x64xi32> to vector<32x64xi32>
    %58 = vector.broadcast %49 : vector<32x1xi32> to vector<32x64xi32>
    %59 = arith.cmpi eq, %57, %58 : vector<32x64xi32>
    %60 = vector.shape_cast %56 : vector<32x1xf32> to vector<32x1xf32>
    %61 = vector.broadcast %60 : vector<32x1xf32> to vector<32x64xf32>
    %62 = arith.select %59, %61, %42 : vector<32x64xi1>, vector<32x64xf32>
    %63 = arith.addf %43, %56 : vector<32x1xf32>
    %c2147483647_i32_24 = arith.constant 2147483647 : i32
    %64 = vector.broadcast %c2147483647_i32_24 : i32 to vector<32x64xi32>
    %65 = arith.select %59, %64, %45 : vector<32x64xi1>, vector<32x64xi32>
    %cst_25 = arith.constant dense<2147483647> : vector<32xi32>
    %66 = vector.multi_reduction <minsi>, %65, %cst_25 [1] : vector<32x64xi32> to vector<32xi32>
    %67 = vector.shape_cast %66 : vector<32xi32> to vector<32x1xi32>
    %c63_i32_26 = arith.constant 63 : i32
    %68 = vector.broadcast %c63_i32_26 : i32 to vector<32x1xi32>
    %69 = arith.andi %67, %68 : vector<32x1xi32>
    %c-64_i32_27 = arith.constant -64 : i32
    %70 = vector.broadcast %c-64_i32_27 : i32 to vector<32x1xi32>
    %71 = arith.andi %67, %70 : vector<32x1xi32>
    %72 = tpu.bitcast %71 : vector<32x1xi32> -> vector<32x1xf32>
    %cst_28 = arith.constant 1.000000e-16 : f32
    %73 = vector.broadcast %cst_28 : f32 to vector<32x1xf32>
    %74 = arith.maximumf %72, %73 : vector<32x1xf32>
    %cst_29 = arith.constant 1.000000e+00 : f32
    %75 = vector.broadcast %cst_29 : f32 to vector<32x1xf32>
    %76 = arith.divf %75, %74 : vector<32x1xf32>
    %77 = vector.broadcast %18 : vector<1x64xi32> to vector<32x64xi32>
    %78 = vector.broadcast %69 : vector<32x1xi32> to vector<32x64xi32>
    %79 = arith.cmpi eq, %77, %78 : vector<32x64xi32>
    %80 = vector.shape_cast %76 : vector<32x1xf32> to vector<32x1xf32>
    %81 = vector.broadcast %80 : vector<32x1xf32> to vector<32x64xf32>
    %82 = arith.select %79, %81, %62 : vector<32x64xi1>, vector<32x64xf32>
    %83 = arith.addf %63, %76 : vector<32x1xf32>
    %c0_30 = arith.constant 0 : index
    %c0_31 = arith.constant 0 : index
    %84 = vector.load %arg1[%c0_30, %c0_31] : memref<64x16xf32, #tpu.memory_space<vmem>>, vector<64x16xf32>
    %cst_32 = arith.constant dense<0.000000e+00> : vector<32x16xf32>
    %85 = tpu.matmul %82, %84, %cst_32 {dimension_numbers = #tpu.dot_dimension_numbers<[1], [0], [0], [1], [0, 0, 1, 1], [], []>} : vector<32x64xf32>, vector<64x16xf32>, vector<32x16xf32> -> vector<32x16xf32>
    %86 = tpu.reciprocal %83 {approx = true} : vector<32x1xf32> -> vector<32x1xf32>
    %87 = vector.broadcast %86 : vector<32x1xf32> to vector<32x16xf32>
    %88 = arith.mulf %85, %87 : vector<32x16xf32>
    %89 = arith.truncf %88 : vector<32x16xf32> to vector<32x16xbf16>
    %c0_33 = arith.constant 0 : index
    %c0_34 = arith.constant 0 : index
    %90 = vector.load %arg9[%c0_33, %c0_34] : memref<16x64xbf16, #tpu.memory_space<vmem>>, vector<16x64xbf16>
    %cst_35 = arith.constant dense<0.000000e+00> : vector<32x64xf32>
    %91 = tpu.matmul %89, %90, %cst_35 {dimension_numbers = #tpu.dot_dimension_numbers<[1], [0], [0], [1], [0, 0, 1, 1], [], []>} : vector<32x16xbf16>, vector<16x64xbf16>, vector<32x64xf32> -> vector<32x64xf32>
    %c0_36 = arith.constant 0 : index
    %c0_37 = arith.constant 0 : index
    %92 = vector.load %arg5[%c0_36, %c0_37] : memref<32x16xf32, #tpu.memory_space<vmem>>, vector<32x16xf32>
    %93 = arith.truncf %92 : vector<32x16xf32> to vector<32x16xbf16>
    %c0_38 = arith.constant 0 : index
    %c0_39 = arith.constant 0 : index
    %94 = vector.load %arg10[%c0_38, %c0_39] : memref<16x64xbf16, #tpu.memory_space<vmem>>, vector<16x64xbf16>
    %cst_40 = arith.constant dense<0.000000e+00> : vector<32x64xf32>
    %95 = tpu.matmul %93, %94, %cst_40 {dimension_numbers = #tpu.dot_dimension_numbers<[1], [0], [0], [1], [0, 0, 1, 1], [], []>} : vector<32x16xbf16>, vector<16x64xbf16>, vector<32x64xf32> -> vector<32x64xf32>
    %96 = arith.addf %91, %95 : vector<32x64xf32>
    %c0_41 = arith.constant 0 : index
    %c0_42 = arith.constant 0 : index
    %97 = vector.load %arg11[%c0_41, %c0_42] : memref<1x64xf32, #tpu.memory_space<vmem>>, vector<1x64xf32>
    %98 = vector.broadcast %97 : vector<1x64xf32> to vector<32x64xf32>
    %99 = arith.addf %96, %98 : vector<32x64xf32>
    %cst_43 = arith.constant 0.000000e+00 : f32
    %100 = vector.broadcast %cst_43 : f32 to vector<32x64xf32>
    %101 = arith.maximumf %99, %100 : vector<32x64xf32>
    %102 = arith.truncf %101 : vector<32x64xf32> to vector<32x64xbf16>
    %c0_44 = arith.constant 0 : index
    %c0_45 = arith.constant 0 : index
    %103 = vector.load %arg12[%c0_44, %c0_45] : memref<64x128xbf16, #tpu.memory_space<vmem>>, vector<64x128xbf16>
    %cst_46 = arith.constant dense<0.000000e+00> : vector<32x128xf32>
    %104 = tpu.matmul %102, %103, %cst_46 {dimension_numbers = #tpu.dot_dimension_numbers<[1], [0], [0], [1], [0, 0, 1, 1], [], []>} : vector<32x64xbf16>, vector<64x128xbf16>, vector<32x128xf32> -> vector<32x128xf32>
    %c0_47 = arith.constant 0 : index
    %c0_48 = arith.constant 0 : index
    %105 = vector.load %arg13[%c0_47, %c0_48] : memref<1x128xf32, #tpu.memory_space<vmem>>, vector<1x128xf32>
    %106 = vector.broadcast %105 : vector<1x128xf32> to vector<32x128xf32>
    %107 = arith.addf %104, %106 : vector<32x128xf32>
    %cst_49 = arith.constant 0.000000e+00 : f32
    %108 = vector.broadcast %cst_49 : f32 to vector<32x128xf32>
    %109 = arith.maximumf %107, %108 : vector<32x128xf32>
    %c0_50 = arith.constant 0 : index
    %c0_51 = arith.constant 0 : index
    %110 = vector.load %arg14[%c0_50, %c0_51] : memref<1x128xf32, #tpu.memory_space<vmem>>, vector<1x128xf32>
    %111 = vector.broadcast %110 : vector<1x128xf32> to vector<32x128xf32>
    %112 = arith.mulf %109, %111 : vector<32x128xf32>
    %c0_52 = arith.constant 0 : index
    %c0_53 = arith.constant 0 : index
    %113 = vector.load %arg15[%c0_52, %c0_53] : memref<1x128xf32, #tpu.memory_space<vmem>>, vector<1x128xf32>
    %114 = vector.broadcast %113 : vector<1x128xf32> to vector<32x128xf32>
    %115 = arith.addf %112, %114 : vector<32x128xf32>
    %c0_54 = arith.constant 0 : index
    %c0_55 = arith.constant 0 : index
    %116 = vector.load %arg16[%c0_54, %c0_55] : memref<32x128xf32, #tpu.memory_space<vmem>>, vector<32x128xf32>
    tpu.vector_store %arg16[%c0_54, %c0_55], %115 {strides = array<i32>} : memref<32x128xf32, #tpu.memory_space<vmem>>, vector<32x128xf32>,
    return
  }
  func.func @transform_0(%arg0: i32) -> (i32, i32) {
    %c0_i32 = arith.constant 0 : i32
    %c0_i32_0 = arith.constant 0 : i32
    %c0_i32_1 = arith.constant 0 : i32
    return %c0_i32, %c0_i32_0 : i32, i32
  }
  func.func @transform_1(%arg0: i32) -> (i32, i32) {
    %c0_i32 = arith.constant 0 : i32
    %c0_i32_0 = arith.constant 0 : i32
    %c0_i32_1 = arith.constant 0 : i32
    return %c0_i32, %c0_i32_0 : i32, i32
  }
  func.func @transform_2(%arg0: i32) -> (i32, i32) {
    %c0_i32 = arith.constant 0 : i32
    %c0_i32_0 = arith.constant 0 : i32
    %c0_i32_1 = arith.constant 0 : i32
    return %c0_i32, %c0_i32_0 : i32, i32
  }
  func.func @transform_3(%arg0: i32) -> (i32, i32) {
    %c0_i32 = arith.constant 0 : i32
    %c0_i32_0 = arith.constant 0 : i32
    %c0_i32_1 = arith.constant 0 : i32
    return %c0_i32, %c0_i32_0 : i32, i32
  }
  func.func @transform_4(%arg0: i32) -> (i32, i32) {
    %c0_i32 = arith.constant 0 : i32
    %c0_i32_0 = arith.constant 0 : i32
    return %arg0, %c0_i32 : i32, i32
  }
  func.func @transform_5(%arg0: i32) -> (i32, i32) {
    %c0_i32 = arith.constant 0 : i32
    %c0_i32_0 = arith.constant 0 : i32
    return %arg0, %c0_i32 : i32, i32
  }
  func.func @transform_6(%arg0: i32) -> (i32, i32) {
    %c0_i32 = arith.constant 0 : i32
    %c0_i32_0 = arith.constant 0 : i32
    return %arg0, %c0_i32 : i32, i32
  }
  func.func @transform_7(%arg0: i32) -> (i32, i32) {
    %c0_i32 = arith.constant 0 : i32
    %c0_i32_0 = arith.constant 0 : i32
    return %arg0, %c0_i32 : i32, i32
  }
  func.func @transform_8(%arg0: i32) -> (i32, i32) {
    %c0_i32 = arith.constant 0 : i32
    %c0_i32_0 = arith.constant 0 : i32
    %c0_i32_1 = arith.constant 0 : i32
    return %c0_i32, %c0_i32_0 : i32, i32
  }
  func.func @transform_9(%arg0: i32) -> (i32, i32) {
    %c0_i32 = arith.constant 0 : i32
    %c0_i32_0 = arith.constant 0 : i32
    %c0_i32_1 = arith.constant 0 : i32
    return %c0_i32, %c0_i32_0 : i32, i32
  }
  func.func @transform_10(%arg0: i32) -> (i32, i32) {
    %c0_i32 = arith.constant 0 : i32
    %c0_i32_0 = arith.constant 0 : i32
    %c0_i32_1 = arith.constant 0 : i32
    return %c0_i32, %c0_i32_0 : i32, i32
  }
  func.func @transform_11(%arg0: i32) -> (i32, i32) {
    %c0_i32 = arith.constant 0 : i32
    %c0_i32_0 = arith.constant 0 : i32
    %c0_i32_1 = arith.constant 0 : i32
    return %c0_i32, %c0_i32_0 : i32, i32
  }
  func.func @transform_12(%arg0: i32) -> (i32, i32) {
    %c0_i32 = arith.constant 0 : i32
    %c0_i32_0 = arith.constant 0 : i32
    %c0_i32_1 = arith.constant 0 : i32
    return %c0_i32, %c0_i32_0 : i32, i32
  }
  func.func @transform_13(%arg0: i32) -> (i32, i32) {
    %c0_i32 = arith.constant 0 : i32
    %c0_i32_0 = arith.constant 0 : i32
    %c0_i32_1 = arith.constant 0 : i32
    return %c0_i32, %c0_i32_0 : i32, i32
  }
  func.func @transform_14(%arg0: i32) -> (i32, i32) {
    %c0_i32 = arith.constant 0 : i32
    %c0_i32_0 = arith.constant 0 : i32
    %c0_i32_1 = arith.constant 0 : i32
    return %c0_i32, %c0_i32_0 : i32, i32
  }
  func.func @transform_15(%arg0: i32) -> (i32, i32) {
    %c0_i32 = arith.constant 0 : i32
    %c0_i32_0 = arith.constant 0 : i32
    return %arg0, %c0_i32 : i32, i32
  }
}

</mosaic_0001>

<bundles_post_ra>
// kernel: tpu_custom_call.1
= control target key start
LH: loop header
LB: loop body
LE: loop exit
PB: predicated region body
PF: predicated region fallthrough
CT: control target
= control target key end

     0   :  { %s2295_s0 = inlined_call_operand.vmem [shape: f32[64,16], index: 0, kind: input, shape index: {}]   ;;  %s2296_s1 = inlined_call_operand.vmem [shape: f32[8,64], index: 1, kind: input, shape index: {}]   ;;  %s2297_s2 = inlined_call_operand.vmem [shape: f32[1,64], index: 2, kind: input, shape index: {}]   ;;  %s2298_s3 = inlined_call_operand.vmem [shape: s32[1,64], index: 3, kind: input, shape index: {}]   ;;  %s2299_s4 = inlined_call_operand.vmem [shape: f32[96,16], index: 4, kind: input, shape index: {}]   ;;  %s2300_s5 = inlined_call_operand.vmem [shape: f32[96,8], index: 5, kind: input, shape index: {}]   ;;  %s2301_s6 = inlined_call_operand.vmem [shape: f32[96,1], index: 6, kind: input, shape index: {}]   ;;  %s2302_s7 = inlined_call_operand.vmem [shape: s32[96,1], index: 7, kind: input, shape index: {}]   ;;  %s2303_s8 = inlined_call_operand.vmem [shape: bf16[16,64], index: 8, kind: input, shape index: {}]   ;;  %s2304_s9 = inlined_call_operand.vmem [shape: bf16[16,64], index: 9, kind: input, shape index: {}]   ;;  %s2305_s10 = inlined_call_operand.vmem [shape: f32[1,64], index: 10, kind: input, shape index: {}]   ;;  %s2306_s11 = inlined_call_operand.vmem [shape: bf16[64,128], index: 11, kind: input, shape index: {}]   ;;  %s2307_s12 = inlined_call_operand.vmem [shape: f32[1,128], index: 12, kind: input, shape index: {}]   ;;  %s2308_s13 = inlined_call_operand.vmem [shape: f32[1,128], index: 13, kind: input, shape index: {}]   ;;  %s2309_s14 = inlined_call_operand.vmem [shape: f32[1,128], index: 14, kind: input, shape index: {}]   ;;  %s2310_s15 = inlined_call_operand.hbm [shape: f32[96,128], index: 15, kind: output, shape index: {}]  }
   0x1   :  { %2311 = sst [smem:[#allocation6_spill]] %s2295_s0 }
   0x2   :  { %2312 = sst [smem:[#allocation7_spill]] %s2296_s1 }
   0x3   :  { %2313 = sst [smem:[#allocation8_spill]] %s2297_s2 }
   0x4   :  { %2314 = sst [smem:[#allocation9_spill]] %s2298_s3 }
   0x5   :  { %20 = vsyncpa [#allocation3], 0 }
   0x6   :  { %22 = vsyncpa [#allocation3 + $0x1], 0  ;;  %s1906_s18 = smov 0   ;;  %s1908_s19 = smov 0  }
   0x7   :  { %s1910_s20 = smov 0   ;;  %s1912_s21 = smov 0  }
   0x8 LB: > { %s1927_s22 = sadd.s32 4294967295, %s1820_s21   ;;  %s1550_s23 = sadd.s32 4294967294, %s1820_s21   ;;  %s1820_s21 = sphi %s1912_s21, %s2342_s21   ;;  %s1816_s20 = sphi %s1910_s20, %s2341_s20   ;;  %s1812_s19 = sphi %s1908_s19, %s2340_s19   ;;  %s1808_s18 = sphi %s1906_s18, %s2339_s18  }
   0x9   : > { %s1931_s24 = sadd.s32 1, %s1820_s21   ;;  %s370_s25 = sadd.s32 1, %s1816_s20 }
   0xa   : > { %s367_s26 = ssub.s32 %s1820_s21, %s1931_s24  ;;  %p380_p0 = scmp.ne.s32.totalorder %s1816_s20, %s1812_s19 }
   0xb   : > { %p368_p1 = scmp.eq.s32.totalorder %s367_s26, 0  ;;  %p381_p2 = scmp.eq.s32.totalorder %s1927_s22, 2 }
   0xc   : > { %p386_p3 = scmp.ne.s32.totalorder %s1812_s19, %s1808_s18  ;;  %p387_p4 = scmp.eq.s32.totalorder %s1550_s23, 2 }
   0xd   : > { %s1942_s27 = scalar_select %p368_p1, %s1816_s20, %s370_s25  }
   0xe   : > { %p1944_p5 = por %p381_p2, %p380_p0  ;;  %p1948_p6 = por %p387_p4, %p386_p3 }
   0xf   : > { %2315 = sst [smem:[#allocation5_spill]] %s1942_s27  ;;  %p1553_p7 = scmp.ge.s32.totalorder %s1820_s21, 1 }
  0x10   : > { %p474_p8 = scmp.lt.s32.totalorder %s1820_s21, 4 }
  0x12   : > { %p475_p9 = pnand %p1553_p7, %p474_p8 }
  0x13   : > { %s2318_s1 = sld [smem:[#allocation7_spill]] (!%p475_p9)  ;;  %s1555_s17 = sshll.u32 (!%p475_p9), %s1927_s22, 2 }
  0x14   : > { %478 = sbr.rel (%p475_p9) target bundleno = 1758 (0x6de), region = 80  ;;  %p538_p10 = scmp.lt.s32.totalorder (!%p475_p9), %s1555_s17, 11 }
  0x15   : > { %s2319_s2 = sld [smem:[#allocation8_spill]] (!%p475_p9) }
  0x16   : > { %s2320_s3 = sld [smem:[#allocation9_spill]] (!%p475_p9) }
  0x17   : > { %s2337_s0 = sld [smem:[#allocation6_spill]] (!%p475_p9) }
  0x19   : > { %v567_v0 = vld [vmem:[%s2318_s1] sm:$0xff]  ;;  %v1822_v1 = vmov 0   ;;  %s2344_s17 = smov (!%p538_p10, %s1555_s17), 11  ;;  %vm568_vm0 = vcmask 64512   ;;  %v738_v22 = vlaneseq  ;;  %vm752_vm3 = vcmask 523264  }
  0x1a   : > { %1624 = vmatprep.subr.mxu0 %v567_v0  ;;  %1720 = vset.pattern.permute.xlu0 %v1822_v1  ;;  %s1958_s23 = sshll.u32 %s2344_s17, 3 }
  0x1b   : > { %1625 = vmatpush3.msra.mxu0 %v567_v0  ;;  %1721 = vset.pattern.permute.xlu1 %v1822_v1  ;;  %s547_s30 = scalar_lea.vmem %s2300_s5, %s1958_s23  ;;  %s553_s27 = scalar_lea.vmem %s2301_s6, %s1958_s23  ;;  %v1567_v17 = vld [vmem:[%s2319_s2] ss:$0 sm:$0xff]  ;;  %v1982_v32 = vand.u32 127, %v738_v22 }
  0x1c   : > { %v563_v2 = vld [vmem:[%s547_s30] sm:$0xff]  ;;  %v564_v3 = vld [vmem:[%s547_s30 + $0x8] sm:$0xff]  ;;  %v565_v4 = vld [vmem:[%s547_s30 + $0x10] sm:$0xff]  ;;  %s559_s1 = scalar_lea.vmem %s2302_s7, %s1958_s23  ;;  %s534_s2 = sand.u32 1, %s1812_s19  }
  0x1d   : > { %1626 = vmatprep.mubr.msk.f32.mxu0 %vm568_vm0, %v563_v2  ;;  %v666_v5 = vld [vmem:[%s553_s27] sm:$0xff]  ;;  %v668_v6 = vld [vmem:[%s553_s27 + $0x10] sm:$0xff]  ;;  %v566_v7 = vld [vmem:[%s547_s30 + $0x18] sm:$0xff]  ;;  %s1554_s25 = sshll.u32 %s534_s2, 5 }
  0x1e   : > { %1627 = vmatmul.mubr.msk.f32.vlgmr.msra.gmra.mxu0 %vm568_vm0, %v564_v3  ;;  %673 = vperm.xlu0 %1720, %v666_v5   ;;  %v667_v8 = vld [vmem:[%s553_s27 + $0x8] sm:$0xff]  ;;  %v669_v9 = vld [vmem:[%s553_s27 + $0x18] sm:$0xff]  ;;  %v709_v10 = vld [vmem:[%s559_s1] sm:$0xff] }
  0x1f   : > { %1629 = vmatprep.mubr.msk.f32.mxu0 %vm568_vm0, %v565_v4  ;;  %683 = vperm.xlu1 %1721, %v668_v6   ;;  %v710_v11 = vld [vmem:[%s559_s1 + $0x8] sm:$0xff]  ;;  %v711_v12 = vld [vmem:[%s559_s1 + $0x10] sm:$0xff]  ;;  %v712_v13 = vld [vmem:[%s559_s1 + $0x18] sm:$0xff]  ;;  %s1823_s1 = smov [#allocation2]  }
  0x20   : > { %v1568_v28 = vld [vmem:[%s2320_s3] ss:$0 sm:$0xff]  ;;  %s2183_s3 = scalar_lea.vmem %s2299_s4, %s1958_s23  ;;  %s536_s23 = scalar_lea.vmem [#allocation2], %s1554_s25 }
  0x21   : > { %s1452_s26 = sshll.u32 %s536_s23, 4  ;;  %s2255_s25 = scalar_lea.sflag [#allocation3], %s534_s2  ;;  %s2251_s26 = int_to_ptr.vmem [resolvable:$true] %s1452_s26 }
  0x22   : > { %1630 = vmatmul.mubr.msk.f32.gmra.mxu0 %vm568_vm0, %v566_v7  ;;  %678 = vperm.xlu0 %1720, %v667_v8   ;;  %s1764_s27 = sshll.u32 %s1823_s1, 4  ;;  %s1765_s27 = int_to_ptr.vmem [resolvable:$false] %s1764_s27 }
  0x23   : > { %688 = vperm.xlu1 %1721, %v669_v9   ;;  %p1767_p0 = scmp.lt.s32.totalorder %s2251_s26, %s1765_s27 }
  0x26   : > { %715 = vperm.xlu0 %1720, %v709_v10  }
  0x27   : > { %718 = vperm.xlu1 %1721, %v710_v11  }
  0x2a   : > { %721 = vperm.xlu0 %1720, %v711_v12  }
  0x2b   : > { %724 = vperm.xlu1 %1721, %v712_v13  }
  0x99   : > { %v674_v15 = vpop.permute.xlu0 %673 }
  0x9a   : > { %v684_v14 = vpop.permute.xlu1 %683  ;;  %v697_v23 = vadd.f32 %v1567_v17, %v674_v15 }
  0x9b   : > { %v699_v33 = vadd.f32 %v1567_v17, %v684_v14 }
  0x9d   : > { %v679_v18 = vpop.permute.xlu0 %678 }
  0x9e   : > { %v689_v16 = vpop.permute.xlu1 %688  ;;  %v698_v19 = vadd.f32 %v1567_v17, %v679_v18 }
  0x9f   : > { %v700_v24 = vadd.f32 %v1567_v17, %v689_v16 }
  0xa1   : > { %v716_v25 = vpop.permute.xlu0 %715 }
  0xa2   : > { %v719_v20 = vpop.permute.xlu1 %718  ;;  %vm730_vm2 = vcmp.eq.s32.totalorder %v716_v25, %v1568_v28 }
  0xa3   : > { %vm731_vm1 = vcmp.eq.s32.totalorder %v719_v20, %v1568_v28 }
  0xa5   : > { %v722_v40 = vpop.permute.xlu0 %721 }
  0xa6   : > { %v725_v35 = vpop.permute.xlu1 %724  ;;  %vm732_vm5 = vcmp.eq.s32.totalorder %v722_v40, %v1568_v28 }
  0xa7   : > { %vm733_vm4 = vcmp.eq.s32.totalorder %v725_v35, %v1568_v28 }
  0xde   : > { %v1628_v21 = vpop.f32.mrf.mxu0 }
  0xdf   : > { %v702_v26 = vadd.f32 %v1628_v21, %v698_v19 }
  0xe0   : > { %v647_v27 = vpop.f32.mrf.mxu0 }
  0xe1   : > { %v706_v29 = vmax.f32 %v702_v26, 0.0  ;;  %v701_v30 = vadd.f32 %v697_v23, %v647_v27 }
  0xe2   : > { %v1631_v31 = vpop.f32.mrf.mxu0 }
  0xe3   : > { %v735_v34 = vsel %vm731_vm1, %v706_v29, 1e+30  ;;  %v705_v36 = vmax.f32 %v701_v30, 0.0  ;;  %v704_v37 = vadd.f32 %v1631_v31, %v700_v24 }
  0xe4   : > { %v745_v38 = vand.u32 4294967232, %v735_v34  ;;  %v657_v39 = vpop.f32.mrf.mxu0 }
  0xe5   : > { %v734_v41 = vsel %vm730_vm2, %v705_v36, 1e+30  ;;  %v708_v42 = vmax.f32 %v704_v37, 0.0  ;;  %v703_v43 = vadd.f32 %v699_v33, %v657_v39 }
  0xe6   : > { %v744_v44 = vand.u32 4294967232, %v734_v41  ;;  %v1985_v45 = vor.u32 %v745_v38, %v1982_v32 }
  0xe7   : > { %v737_v46 = vsel %vm733_vm4, %v708_v42, 1e+30  ;;  %v707_v47 = vmax.f32 %v703_v43, 0.0 }
  0xe8   : > { %v747_v48 = vand.u32 4294967232, %v737_v46  ;;  %v768_v49 = vsel %vm752_vm3, %v1985_v45, 2147483647  ;;  %v1990_v50 = vor.u32 %v744_v44, %v1982_v32 }
  0xe9   : > { %v736_v51 = vsel %vm732_vm5, %v707_v47, 1e+30  ;;  %v770_v52 = vshra.s32 %v768_v49, 16  ;;  %v769_v2 = vand.u32 65535, %v768_v49 }
  0xea   : > { %v746_v53 = vand.u32 4294967232, %v736_v51  ;;  %v753_v54 = vsel %vm752_vm3, %v1990_v50, 2147483647  ;;  %v1995_v55 = vor.u32 %v747_v48, %v1982_v32 }
  0xeb   : > { %v772_v56 = vcvt.s32.f32 %v770_v52  ;;  %v755_v57 = vshra.s32 %v753_v54, 16  ;;  %v754_v3 = vand.u32 65535, %v753_v54  ;;  %v771_v5 = vcvt.s32.f32 %v769_v2 }
  0xec   : > { %v1998_v58 = vor.u32 %v746_v53, %v1982_v32  ;;  %v798_v61 = vsel %vm752_vm3, %v1995_v55, 2147483647 }
  0xed   : > { %773 = vmin.xlane.f32.xlu1 %v772_v56  ;;  %v757_v59 = vcvt.s32.f32 %v755_v57  ;;  %v800_v0 = vshra.s32 %v798_v61, 16  ;;  %v756_v8 = vcvt.s32.f32 %v754_v3  ;;  %v799_v13 = vand.u32 65535, %v798_v61 }
  0xee   : > { %v783_v60 = vsel %vm752_vm3, %v1998_v58, 2147483647 }
  0xef   : > { %758 = vmin.xlane.f32.xlu0 %v757_v59  ;;  %v785_v62 = vshra.s32 %v783_v60, 16  ;;  %v802_v1 = vcvt.s32.f32 %v800_v0  ;;  %v784_v9 = vand.u32 65535, %v783_v60  ;;  %v801_v16 = vcvt.s32.f32 %v799_v13 }
  0xf1   : > { %v787_v63 = vcvt.s32.f32 %v785_v62  ;;  %v786_v12 = vcvt.s32.f32 %v784_v9 }
  0xf3   : > { %788 = vmin.xlane.f32.xlu0 %v787_v63 }
  0xf7   : > { %803 = vmin.xlane.f32.xlu0 %v802_v1 }
 0x176   : > { %v774_v4 = vpop.xlane.xlu1 %773 }
 0x177   : > { %vm775_vm6 = vcmp.eq.f32.partialorder %v772_v56, %v774_v4  ;;  %v780_v18 = vcvt.f32.s32 %v774_v4 }
 0x178   : > { %v759_v6 = vpop.xlane.xlu0 %758  ;;  %v776_v7 = vsel %vm775_vm6, %v771_v5, inf }
 0x179   : > { %777 = vmin.xlane.f32.xlu0 %v776_v7  ;;  %vm760_vm7 = vcmp.eq.f32.partialorder %v757_v59, %v759_v6  ;;  %v765_v19 = vcvt.f32.s32 %v759_v6  ;;  %v781_v21 = vshll.u32 %v780_v18, 16 }
 0x17a   : > { %v761_v10 = vsel %vm760_vm7, %v756_v8, inf }
 0x17b   : > { %762 = vmin.xlane.f32.xlu1 %v761_v10  ;;  %v766_v24 = vshll.u32 %v765_v19, 16 }
 0x17c   : > { %v789_v11 = vpop.xlane.xlu0 %788 }
 0x17d   : > { %vm790_vm8 = vcmp.eq.f32.partialorder %v787_v63, %v789_v11  ;;  %v795_v25 = vcvt.f32.s32 %v789_v11 }
 0x17e   : > { %v791_v14 = vsel %vm790_vm8, %v786_v12, inf }
 0x17f   : > { %792 = vmin.xlane.f32.xlu1 %v791_v14  ;;  %v796_v31 = vshll.u32 %v795_v25, 16 }
 0x180   : > { %v804_v15 = vpop.xlane.xlu0 %803 }
 0x181   : > { %vm805_vm9 = vcmp.eq.f32.partialorder %v802_v1, %v804_v15  ;;  %v810_v33 = vcvt.f32.s32 %v804_v15 }
 0x182   : > { %v806_v17 = vsel %vm805_vm9, %v801_v16, inf }
 0x183   : > { %807 = vmin.xlane.f32.xlu0 %v806_v17  ;;  %v811_v42 = vshll.u32 %v810_v33, 16 }
 0x202   : > { %v778_v20 = vpop.xlane.xlu0 %777 }
 0x203   : > { %v779_v22 = vcvt.f32.s32 %v778_v20 }
 0x204   : > { %v763_v23 = vpop.xlane.xlu1 %762 }
 0x205   : > { %v2004_v26 = vadd.s32 %v781_v21, %v779_v22  ;;  %v764_v27 = vcvt.f32.s32 %v763_v23 }
 0x207   : > { %v814_v28 = vand.u32 63, %v2004_v26  ;;  %v2007_v29 = vadd.s32 %v766_v24, %v764_v27  ;;  %v818_v16 = vand.u32 4294967232, %v2004_v26 }
 0x208   : > { %v793_v30 = vpop.xlane.xlu1 %792 }
 0x209   : > { %v813_v34 = vand.u32 63, %v2007_v29  ;;  %v794_v35 = vcvt.f32.s32 %v793_v30  ;;  %vm2011_vm10 = vcmp.eq.s32.totalorder %v1982_v32, %v814_v28  ;;  %v817_v18 = vand.u32 4294967232, %v2007_v29 }
 0x20a   : > { %v2020_v38 = vsel %vm2011_vm10, 2147483647, %v1985_v45  ;;  %v826_v22 = vmax.f32 %v818_v16, 1e-16 }
 0x20b   : > { %v2015_v37 = vadd.s32 %v796_v31, %v794_v35  ;;  %v868_v40 = vsel %vm752_vm3, %v2020_v38, 2147483647  ;;  %vm2025_vm11 = vcmp.eq.s32.totalorder %v1982_v32, %v813_v34  ;;  %v825_v30 = vmax.f32 %v817_v18, 1e-16 }
 0x20c   : > { %v808_v39 = vpop.xlane.xlu0 %807  ;;  %v870_v46 = vshra.s32 %v868_v40, 16  ;;  %v2033_v47 = vsel %vm2025_vm11, 2147483647, %v1990_v50  ;;  %v869_v0 = vand.u32 65535, %v868_v40  ;;  %1728 = vrcp.f32 %v826_v22 }
 0x20d   : > { %v815_v43 = vand.u32 63, %v2015_v37  ;;  %v809_v44 = vcvt.f32.s32 %v808_v39  ;;  %v853_v48 = vsel %vm752_vm3, %v2033_v47, 2147483647  ;;  %v819_v31 = vand.u32 4294967232, %v2015_v37  ;;  %v1056_v37 = vld [vmem:[%s2337_s0 + $0x38] sm:$0xff] }
 0x20e   : > { %v872_v51 = vcvt.s32.f32 %v870_v46  ;;  %v855_v52 = vshra.s32 %v853_v48, 16  ;;  %v854_v1 = vand.u32 65535, %v853_v48  ;;  %v871_v3 = vcvt.s32.f32 %v869_v0  ;;  %1632 = vmatprep.subr.mxu1 %v1056_v37 }
 0x20f   : > { %v2035_v45 = vadd.s32 %v811_v42, %v809_v44  ;;  %vm2040_vm12 = vcmp.eq.s32.totalorder %v1982_v32, %v815_v43  ;;  %1730 = vrcp.f32 %v825_v30  ;;  %v827_v48 = vmax.f32 %v819_v31, 1e-16  ;;  %1633 = vmatpush3.msra.mxu1 %v1056_v37 }
 0x210   : > { %v2047_v53 = vsel %vm2040_vm12, 2147483647, %v1998_v58  ;;  %873 = vmin.xlane.f32.xlu0 %v872_v51  ;;  %v857_v56 = vcvt.s32.f32 %v855_v52  ;;  %v856_v6 = vcvt.s32.f32 %v854_v1 }
 0x211   : > { %v816_v50 = vand.u32 63, %v2035_v45  ;;  %v883_v54 = vsel %vm752_vm3, %v2047_v53, 2147483647  ;;  %v820_v26 = vand.u32 4294967232, %v2035_v45 }
 0x212   : > { %v885_v57 = vshra.s32 %v883_v54, 16  ;;  %858 = vmin.xlane.f32.xlu1 %v857_v56  ;;  %v884_v7 = vand.u32 65535, %v883_v54 }
 0x213   : > { %vm2053_vm13 = vcmp.eq.s32.totalorder %v1982_v32, %v816_v50  ;;  %v828_v45 = vmax.f32 %v820_v26, 1e-16 }
 0x214   : > { %v887_v60 = vcvt.s32.f32 %v885_v57  ;;  %v2060_v58 = vsel %vm2053_vm13, 2147483647, %v1995_v55  ;;  %v886_v10 = vcvt.s32.f32 %v884_v7 }
 0x215   : > { %v898_v61 = vsel %vm752_vm3, %v2060_v58, 2147483647 }
 0x216   : > { %v900_v62 = vshra.s32 %v898_v61, 16  ;;  %888 = vmin.xlane.f32.xlu1 %v887_v60  ;;  %v899_v8 = vand.u32 65535, %v898_v61 }
 0x218   : > { %v902_v63 = vcvt.s32.f32 %v900_v62  ;;  %v901_v13 = vcvt.s32.f32 %v899_v8 }
 0x21a   : > { %903 = vmin.xlane.f32.xlu0 %v902_v63 }
 0x299   : > { %v874_v2 = vpop.xlane.xlu0 %873 }
 0x29a   : > { %vm875_vm14 = vcmp.eq.f32.partialorder %v872_v51, %v874_v2  ;;  %v880_v15 = vcvt.f32.s32 %v874_v2 }
 0x29b   : > { %v859_v4 = vpop.xlane.xlu1 %858  ;;  %v876_v5 = vsel %vm875_vm14, %v871_v3, inf }
 0x29c   : > { %877 = vmin.xlane.f32.xlu0 %v876_v5  ;;  %vm860_vm15 = vcmp.eq.f32.partialorder %v857_v56, %v859_v4  ;;  %v865_v17 = vcvt.f32.s32 %v859_v4  ;;  %v881_v20 = vshll.u32 %v880_v15, 16  ;;  %v2104_v15 = vpop.eup %1728 }
 0x29d   : > { %v861_v55 = vsel %vm860_vm15, %v856_v6, inf }
 0x29e   : > { %862 = vmin.xlane.f32.xlu1 %v861_v55  ;;  %v866_v25 = vshll.u32 %v865_v17, 16  ;;  %v2106_v17 = vpop.eup %1730 }
 0x29f   : > { %v889_v9 = vpop.xlane.xlu1 %888  ;;  %v841_v22 = vsel %vm2025_vm11, %v2106_v17, 0.0  ;;  %vm1180_vm11 = vcmask 130048  }
 0x2a0   : > { %vm890_vm0 = vcmp.eq.f32.partialorder %v887_v60, %v889_v9  ;;  %v895_v23 = vcvt.f32.s32 %v889_v9  ;;  %v1050_v60 = vld [vmem:[%s2337_s0 + $0x8] sm:$0xff] }
 0x2a1   : > { %v891_v11 = vsel %vm890_vm0, %v886_v10, inf }
 0x2a2   : > { %892 = vmin.xlane.f32.xlu1 %v891_v11  ;;  %v896_v29 = vshll.u32 %v895_v23, 16 }
 0x2a3   : > { %v904_v12 = vpop.xlane.xlu0 %903 }
 0x2a4   : > { %vm905_vm1 = vcmp.eq.f32.partialorder %v902_v63, %v904_v12  ;;  %v910_v33 = vcvt.f32.s32 %v904_v12 }
 0x2a5   : > { %v906_v14 = vsel %vm905_vm1, %v901_v13, inf }
 0x2a6   : > { %907 = vmin.xlane.f32.xlu0 %v906_v14  ;;  %v911_v51 = vshll.u32 %v910_v33, 16 }
 0x325   : > { %v878_v19 = vpop.xlane.xlu0 %877 }
 0x326   : > { %v879_v21 = vcvt.f32.s32 %v878_v19 }
 0x327   : > { %v863_v24 = vpop.xlane.xlu1 %862 }
 0x328   : > { %v882_v27 = vadd.s32 %v881_v20, %v879_v21  ;;  %v864_v28 = vcvt.f32.s32 %v863_v24  ;;  %v842_v20 = vsel %vm2011_vm10, %v2104_v15, 0.0 }
 0x32a   : > { %v914_v34 = vand.u32 63, %v882_v27  ;;  %v918_v35 = vand.u32 4294967232, %v882_v27  ;;  %v867_v39 = vadd.s32 %v866_v25, %v864_v28 }
 0x32b   : > { %v893_v40 = vpop.xlane.xlu1 %892 }
 0x32c   : > { %v926_v42 = vmax.f32 %v918_v35, 1e-16  ;;  %v913_v43 = vand.u32 63, %v867_v39  ;;  %v917_v44 = vand.u32 4294967232, %v867_v39  ;;  %v894_v46 = vcvt.f32.s32 %v893_v40 }
 0x32d   : > { %vm2069_vm2 = vcmp.eq.s32.totalorder %v1982_v32, %v914_v34 }
 0x32e   : > { %1732 = vrcp.f32 %v926_v42  ;;  %v925_v50 = vmax.f32 %v917_v44, 1e-16  ;;  %v897_v54 = vadd.s32 %v896_v29, %v894_v46  ;;  %v950_v57 = vsel %vm2069_vm2, 2147483647, %v2020_v38 }
 0x32f   : > { %v908_v52 = vpop.xlane.xlu0 %907  ;;  %vm2077_vm4 = vcmp.eq.s32.totalorder %v1982_v32, %v913_v43  ;;  %v968_v0 = vsel %vm752_vm3, %v950_v57, 2147483647  ;;  %v1051_v57 = vld [vmem:[%s2337_s0 + $0x10] sm:$0xff] }
 0x330   : > { %v909_v56 = vcvt.f32.s32 %v908_v52  ;;  %1734 = vrcp.f32 %v925_v50  ;;  %v915_v61 = vand.u32 63, %v897_v54  ;;  %v919_v62 = vand.u32 4294967232, %v897_v54  ;;  %v1055_v50 = vld [vmem:[%s2337_s0 + $0x30] sm:$0xff]  ;;  %v1054_v54 = vld [vmem:[%s2337_s0 + $0x28] sm:$0xff] }
 0x331   : > { %1736 = vrcp.f32 %v827_v48  ;;  %v949_v1 = vsel %vm2077_vm4, 2147483647, %v2033_v47  ;;  %v970_v38 = vshra.s32 %v968_v0, 16  ;;  %v969_v33 = vand.u32 65535, %v968_v0  ;;  %1634 = vmatprep.subr.mxu1 %v1055_v50  ;;  %v1167_v0 = vld [vmem:[%s2183_s3 + $0x8] sm:$0xff] }
 0x332   : > { %v912_v63 = vadd.s32 %v911_v51, %v909_v56  ;;  %v927_v2 = vmax.f32 %v919_v62, 1e-16  ;;  %1738 = vrcp.f32 %v828_v45  ;;  %v953_v5 = vsel %vm752_vm3, %v949_v1, 2147483647  ;;  %1635 = vmatpush3.msra.mxu1 %v1055_v50  ;;  %v1053_v56 = vld [vmem:[%s2337_s0 + $0x20] sm:$0xff]  ;;  %v1052_v45 = vld [vmem:[%s2337_s0 + $0x18] sm:$0xff] }
 0x333   : > { %vm2087_vm5 = vcmp.eq.s32.totalorder %v1982_v32, %v915_v61  ;;  %v972_v55 = vcvt.s32.f32 %v970_v38  ;;  %v955_v8 = vshra.s32 %v953_v5, 16  ;;  %v954_v34 = vand.u32 65535, %v953_v5  ;;  %1636 = vmatprep.subr.mxu1 %v1054_v54  ;;  %v1049_v61 = vld [vmem:[%s2337_s0] sm:$0xff] }
 0x334   : > { %v916_v3 = vand.u32 63, %v912_v63  ;;  %v920_v4 = vand.u32 4294967232, %v912_v63  ;;  %1740 = vrcp.f32 %v927_v2  ;;  %v951_v47 = vsel %vm2087_vm5, 2147483647, %v2047_v53  ;;  %1637 = vmatpush3.msra.mxu1 %v1054_v54  ;;  %v1722_v62 = vld [vmem:[%s2304_s9] sm:$0xff]  }
 0x335   : > { %973 = vmin.xlane.f32.xlu0 %v972_v55  ;;  %v957_v10 = vcvt.s32.f32 %v955_v8  ;;  %v983_v11 = vsel %vm752_vm3, %v951_v47, 2147483647  ;;  %v971_v35 = vcvt.s32.f32 %v969_v33  ;;  %v956_v29 = vcvt.s32.f32 %v954_v34  ;;  %1638 = vmatprep.subr.mxu1 %v1053_v56  ;;  %v1166_v63 = vld [vmem:[%s2183_s3] sm:$0xff] }
 0x336   : > { %v928_v7 = vmax.f32 %v920_v4, 1e-16  ;;  %vm2095_vm6 = vcmp.eq.s32.totalorder %v1982_v32, %v916_v3  ;;  %v985_v13 = vshra.s32 %v983_v11, 16  ;;  %v984_v40 = vand.u32 65535, %v983_v11  ;;  %1639 = vmatpush3.msra.mxu1 %v1053_v56  ;;  %1654 = vmatprep.subr.bf16.mxu0 %v1722_v62 }
 0x337   : > { %v952_v12 = vsel %vm2095_vm6, 2147483647, %v2060_v58  ;;  %958 = vmin.xlane.f32.xlu1 %v957_v10  ;;  %1640 = vmatprep.subr.mxu1 %v1052_v45  ;;  %v1170_v1 = vpack.c.bf16 %v1167_v0, %v1166_v63 }
 0x338   : > { %1742 = vrcp.f32 %v928_v7  ;;  %v998_v14 = vsel %vm752_vm3, %v952_v12, 2147483647  ;;  %v987_v16 = vcvt.s32.f32 %v985_v13  ;;  %v986_v44 = vcvt.s32.f32 %v984_v40  ;;  %1641 = vmatpush3.msra.mxu1 %v1052_v45  ;;  %1655 = vmatpush3.bf16.msra.mxu0 %v1722_v62 }
 0x339   : > { %v1000_v53 = vshra.s32 %v998_v14, 16  ;;  %v999_v42 = vand.u32 65535, %v998_v14  ;;  %1642 = vmatprep.subr.mxu1 %v1051_v57  ;;  %1656 = vmatprep.mubr.msk.bf16.mxu0 %vm1180_vm11, %v1170_v1 }
 0x33a   : > { %1643 = vmatpush3.msra.mxu1 %v1051_v57 }
 0x33b   : > { %v1002_v18 = vcvt.s32.f32 %v1000_v53  ;;  %v2108_v19 = vpop.eup %1732  ;;  %988 = vmin.xlane.f32.xlu1 %v987_v16  ;;  %v1001_v48 = vcvt.s32.f32 %v999_v42  ;;  %1644 = vmatprep.subr.mxu1 %v1050_v60 }
 0x33c   : > { %v2116_v58 = vsel %vm2069_vm2, %v2108_v19, %v842_v20  ;;  %1645 = vmatpush3.msra.mxu1 %v1050_v60  ;;  %v946_v40 = vadd.f32 %v2108_v19, %v2104_v15 }
 0x33d   : > { %1003 = vmin.xlane.f32.xlu0 %v1002_v18  ;;  %v2118_v21 = vpop.eup %1734  ;;  %1646 = vmatprep.subr.mxu1 %v1049_v61 }
 0x33e   : > { %v2123_v23 = vpop.eup %1736  ;;  %v2128_v36 = vsel %vm2077_vm4, %v2118_v21, %v841_v22  ;;  %1647 = vmatpush3.msra.mxu1 %v1049_v61 }
 0x33f   : > { %v2130_v24 = vpop.eup %1738  ;;  %v843_v27 = vsel %vm2040_vm12, %v2123_v23, 0.0 }
 0x340   : > { %v844_v30 = vsel %vm2053_vm13, %v2130_v24, 0.0 }
 0x341   : > { %v2132_v25 = vpop.eup %1740 }
 0x342   : > { %v2140_v41 = vsel %vm2087_vm5, %v2132_v25, %v843_v27  ;;  %v947_v15 = vadd.f32 %v2132_v25, %v2123_v23  ;;  %v1168_v23 = vld [vmem:[%s2183_s3 + $0x10] sm:$0xff]  ;;  %v1169_v25 = vld [vmem:[%s2183_s3 + $0x18] sm:$0xff]  ;;  %s1594_s3 = sshll.u32 %s1927_s22, 9  ;;  %s1760_s22 = scalar_lea.vmem %s2251_s26, 512 }
 0x343   : > { %v1171_v56 = vpack.c.bf16 %v1169_v25, %v1168_v23  ;;  %s2249_s17 = scalar_lea.hbm %s2310_s15, %s1594_s3  ;;  %p1761_p11 = scmp.ne.s32.totalorder %s2251_s26, %s1760_s22 }
 0x344   : > { %s1766_s3 = scalar_lea.vmem %s1765_s27, 1024 }
 0x345   : > { %v2142_v28 = vpop.eup %1742  ;;  %1657 = vmatmul.mubr.msk.bf16.vlgmr.msra.gmra.mxu0 %vm1180_vm11, %v1171_v56  ;;  %p1762_p12 = pnand %p1761_p11, %p1944_p5  ;;  %p1768_p1 = scmp.lt.s32.totalorder %s1766_s3, %s1760_s22 }
 0x346   : > { %v2150_v31 = vsel %vm2095_vm6, %v2142_v28, %v844_v30 }
 0x347   : > { %p1763_p13 = pneg %p1762_p12  ;;  %p1769_p2 = por %p1768_p1, %p1767_p0 }
 0x349   : > { %p1770_p3 = pnand %p1769_p2, %p1763_p13 }
 0x3be   : > { %v974_v49 = vpop.xlane.xlu0 %973 }
 0x3bf   : > { %vm975_vm7 = vcmp.eq.f32.partialorder %v972_v55, %v974_v49  ;;  %v980_v2 = vcvt.f32.s32 %v974_v49 }
 0x3c0   : > { %v959_v39 = vpop.xlane.xlu1 %958  ;;  %v976_v26 = vsel %vm975_vm7, %v971_v35, inf }
 0x3c1   : > { %977 = vmin.xlane.f32.xlu0 %v976_v26  ;;  %vm960_vm8 = vcmp.eq.f32.partialorder %v957_v10, %v959_v39  ;;  %v965_v3 = vcvt.f32.s32 %v959_v39  ;;  %v981_v38 = vshll.u32 %v980_v2, 16 }
 0x3c2   : > { %v961_v43 = vsel %vm960_vm8, %v956_v29, inf }
 0x3c3   : > { %962 = vmin.xlane.f32.xlu1 %v961_v43  ;;  %v966_v7 = vshll.u32 %v965_v3, 16 }
 0x3c4   : > { %v989_v59 = vpop.xlane.xlu1 %988 }
 0x3c5   : > { %vm990_vm9 = vcmp.eq.f32.partialorder %v987_v16, %v989_v59  ;;  %v995_v55 = vcvt.f32.s32 %v989_v59 }
 0x3c6   : > { %v1004_v46 = vpop.xlane.xlu0 %1003  ;;  %v991_v51 = vsel %vm990_vm9, %v986_v44, inf  ;;  %v945_v44 = vadd.f32 %v2118_v21, %v2106_v17  ;;  %v948_v17 = vadd.f32 %v2142_v28, %v2130_v24  ;;  %v1723_v24 = vld [vmem:[%s2303_s8] sm:$0xff]  }
 0x3c7   : > { %vm1005_vm10 = vcmp.eq.f32.partialorder %v1002_v18, %v1004_v46  ;;  %992 = vmin.xlane.f32.xlu1 %v991_v51  ;;  %v1010_v9 = vcvt.f32.s32 %v1004_v46  ;;  %v996_v14 = vshll.u32 %v995_v55, 16  ;;  %1660 = vmatprep.subr.bf16.mxu0 %v1723_v24 }
 0x3c8   : > { %v1006_v52 = vsel %vm1005_vm10, %v1001_v48, inf  ;;  %1661 = vmatpush3.bf16.msra.mxu0 %v1723_v24 }
 0x3c9   : > { %1007 = vmin.xlane.f32.xlu0 %v1006_v52  ;;  %v1011_v20 = vshll.u32 %v1010_v9, 16 }
 0x44a   : > { %v978_v4 = vpop.xlane.xlu0 %977 }
 0x44b   : > { %v979_v5 = vcvt.f32.s32 %v978_v4  ;;  %v1724_v4 = vld [vmem:[%s2306_s11 + $0x18] sm:$0xff]  }
 0x44c   : > { %v963_v6 = vpop.xlane.xlu1 %962  ;;  %1666 = vmatprep.subr.bf16.mxu1 %v1724_v4 }
 0x44d   : > { %v982_v8 = vadd.s32 %v981_v38, %v979_v5  ;;  %v964_v47 = vcvt.f32.s32 %v963_v6  ;;  %v1725_v38 = vld [vmem:[%s2306_s11 + $0x10] sm:$0xff]   ;;  %v1726_v5 = vld [vmem:[%s2306_s11 + $0x8] sm:$0xff]   ;;  %v1727_v6 = vld [vmem:[%s2306_s11] sm:$0xff]  }
 0x44f   : > { %v1018_v10 = vand.u32 4294967232, %v982_v8  ;;  %v967_v11 = vadd.s32 %v966_v7, %v964_v47  ;;  %v1014_v26 = vand.u32 63, %v982_v8  ;;  %v1658_v7 = vpop.f32.mrf.mxu0 }
 0x450   : > { %v993_v12 = vpop.xlane.xlu1 %992 }
 0x451   : > { %v1026_v53 = vmax.f32 %v1018_v10, 1e-16  ;;  %v1017_v16 = vand.u32 4294967232, %v967_v11  ;;  %v994_v18 = vcvt.f32.s32 %v993_v12  ;;  %v1013_v29 = vand.u32 63, %v967_v11  ;;  %v1221_v55 = vpop.f32.mrf.mxu0 }
 0x452   : > { %v1008_v13 = vpop.xlane.xlu0 %1007  ;;  %vm1038_vm12 = vcmp.eq.s32.totalorder %v1982_v32, %v1014_v26 }
 0x453   : > { %v1009_v22 = vcvt.f32.s32 %v1008_v13  ;;  %1744 = vrcp.f32 %v1026_v53  ;;  %v1025_v27 = vmax.f32 %v1017_v16, 1e-16  ;;  %v997_v30 = vadd.s32 %v996_v14, %v994_v18  ;;  %v1659_v8 = vpop.f32.mrf.mxu0  ;;  %v1579_v14 = vld [vmem:[%s2305_s10] ss:$0 sm:$0xff] }
 0x454   : > { %vm1037_vm13 = vcmp.eq.s32.totalorder %v1982_v32, %v1013_v29  ;;  %v1580_v29 = vld [vmem:[%s2307_s12] ss:$0 sm:$0xff] }
 0x455   : > { %v1012_v33 = vadd.s32 %v1011_v20, %v1009_v22  ;;  %1746 = vrcp.f32 %v1025_v27  ;;  %v1019_v34 = vand.u32 4294967232, %v997_v30  ;;  %v1015_v48 = vand.u32 63, %v997_v30  ;;  %v1224_v47 = vpop.f32.mrf.mxu0 }
 0x457   : > { %v1020_v49 = vand.u32 4294967232, %v1012_v33  ;;  %v1027_v35 = vmax.f32 %v1019_v34, 1e-16  ;;  %v1016_v51 = vand.u32 63, %v1012_v33  ;;  %vm1039_vm14 = vcmp.eq.s32.totalorder %v1982_v32, %v1015_v48  ;;  %v1588_v48 = vld [vmem:[%s2309_s14] ss:$0 sm:$0xff] }
 0x459   : > { %v1028_v39 = vmax.f32 %v1020_v49, 1e-16  ;;  %1748 = vrcp.f32 %v1027_v35  ;;  %vm1040_vm15 = vcmp.eq.s32.totalorder %v1982_v32, %v1016_v51 }
 0x45b   : > { %1750 = vrcp.f32 %v1028_v39 }
 0x460   : > { %v1745_v42 = vpop.eup %1744 }
 0x461   : > { %v1042_v43 = vsel %vm1038_vm12, %v1745_v42, %v2116_v58  ;;  %v1046_v59 = vadd.f32 %v1745_v42, %v946_v40 }
 0x462   : > { %v1747_v46 = vpop.eup %1746 }
 0x463   : > { %v1041_v52 = vsel %vm1037_vm13, %v1747_v46, %v2128_v36  ;;  %v1045_v37 = vadd.f32 %v1747_v46, %v945_v44  ;;  %1752 = vrcp.f32 %v1046_v59 }
 0x464   : > { %1648 = vmatprep.mubr.msk.f32.mxu1 %vm752_vm3, %v1041_v52 }
 0x465   : > { %1649 = vmatmul.mubr.msk.f32.vlgmr.msra.gmra.mxu1 %vm752_vm3, %v1042_v43  ;;  %1754 = vrcp.f32 %v1045_v37  ;;  %v1587_v43 = vld [vmem:[%s2308_s13] ss:$0 sm:$0xff] }
 0x466   : > { %v1749_v19 = vpop.eup %1748  ;;  %1667 = vmatpush3.bf16.msra.mxu1 %v1724_v4 }
 0x467   : > { %v1043_v21 = vsel %vm1039_vm14, %v1749_v19, %v2140_v41  ;;  %v1047_v36 = vadd.f32 %v1749_v19, %v947_v15  ;;  %1668 = vmatprep.subr.bf16.mxu1 %v1725_v38 }
 0x468   : > { %v1751_v58 = vpop.eup %1750  ;;  %1651 = vmatprep.mubr.msk.f32.mxu1 %vm752_vm3, %v1043_v21 }
 0x469   : > { %v1044_v50 = vsel %vm1040_vm15, %v1751_v58, %v2150_v31  ;;  %v1048_v54 = vadd.f32 %v1751_v58, %v948_v17  ;;  %1756 = vrcp.f32 %v1047_v36 }
 0x46a   : > { %1652 = vmatmul.mubr.msk.f32.gmra.mxu1 %vm752_vm3, %v1044_v50 }
 0x46b   : > { %1758 = vrcp.f32 %v1048_v54  ;;  %1669 = vmatpush3.bf16.msra.mxu1 %v1725_v38 }
 0x46c   : > { %1670 = vmatprep.subr.bf16.mxu1 %v1726_v5 }
 0x46f   : > { %1671 = vmatpush3.bf16.msra.mxu1 %v1726_v5 }
 0x470   : > { %v1753_v41 = vpop.eup %1752  ;;  %1672 = vmatprep.subr.bf16.mxu1 %v1727_v6 }
 0x472   : > { %v1755_v28 = vpop.eup %1754 }
 0x473   : > { %1673 = vmatpush3.bf16.msra.mxu1 %v1727_v6 }
 0x476   : > { %v1757_v61 = vpop.eup %1756 }
 0x478   : > { %v1759_v63 = vpop.eup %1758 }
 0x525   : > { %v1650_v32 = vpop.f32.mrf.mxu1 }
 0x526   : > { %v1159_v45 = vmul.f32 %v1753_v41, %v1650_v32 }
 0x527   : > { %v1135_v31 = vpop.f32.mrf.mxu1 }
 0x528   : > { %v1158_v57 = vmul.f32 %v1755_v28, %v1135_v31 }
 0x52a   : > { %v1653_v60 = vpop.f32.mrf.mxu1  ;;  %v1162_v62 = vpack.c.bf16 %v1159_v45, %v1158_v57 }
 0x52b   : > { %v1161_v1 = vmul.f32 %v1759_v63, %v1653_v60 }
 0x52c   : > { %v1145_v0 = vpop.f32.mrf.mxu1  ;;  %1662 = vmatprep.mubr.msk.bf16.mxu0 %vm1180_vm11, %v1162_v62 }
 0x52d   : > { %v1160_v2 = vmul.f32 %v1757_v61, %v1145_v0 }
 0x52f   : > { %v1163_v3 = vpack.c.bf16 %v1161_v1, %v1160_v2 }
 0x531   : > { %1663 = vmatmul.mubr.msk.bf16.vlgmr.msra.gmra.mxu0 %vm1180_vm11, %v1163_v3 }
 0x5f1   : > { %v1664_v9 = vpop.f32.mrf.mxu0 }
 0x5f2   : > { %v1291_v12 = vadd.f32 %v1664_v9, %v1658_v7 }
 0x5f3   : > { %v1282_v10 = vpop.f32.mrf.mxu0 }
 0x5f4   : > { %v1283_v11 = vadd.f32 %v1282_v10, %v1221_v55  ;;  %v1306_v27 = vadd.f32 %v1579_v14, %v1291_v12 }
 0x5f5   : > { %v1665_v13 = vpop.f32.mrf.mxu0 }
 0x5f6   : > { %v1294_v53 = vadd.f32 %v1665_v13, %v1659_v8  ;;  %v1304_v18 = vadd.f32 %v1579_v14, %v1283_v11  ;;  %v1310_v35 = vmax.f32 %v1306_v27, 0.0 }
 0x5f7   : > { %v1285_v16 = vpop.f32.mrf.mxu0 }
 0x5f8   : > { %v1307_v20 = vadd.f32 %v1579_v14, %v1294_v53  ;;  %v1286_v22 = vadd.f32 %v1285_v16, %v1224_v47  ;;  %v1308_v34 = vmax.f32 %v1304_v18, 0.0 }
 0x5fa   : > { %v1305_v30 = vadd.f32 %v1579_v14, %v1286_v22  ;;  %v1311_v33 = vmax.f32 %v1307_v20, 0.0 }
 0x5fc   : > { %v1309_v49 = vmax.f32 %v1305_v30, 0.0  ;;  %v1313_v26 = vpack.c.bf16 %v1311_v33, %v1310_v35 }
 0x5fe   : > { %v1312_v39 = vpack.c.bf16 %v1309_v49, %v1308_v34 }
 0x600   : > { %1674 = vmatprep.mubr.msk.bf16.mxu1 %vm752_vm3, %v1312_v39 }
 0x601   : > { %1675 = vmatmul.mubr.msk.bf16.vlgmr.msra.gmra.mxu1 %vm752_vm3, %v1313_v26 }
 0x6c1   : > { %v1676_v40 = vpop.f32.mrf.mxu1 }
 0x6c2   : > { %v1402_v42 = vadd.f32 %v1676_v40, %v1580_v29 }
 0x6c3   : > { %v1393_v59 = vpop.f32.mrf.mxu1 }
 0x6c4   : > { %v1410_v44 = vmax.f32 %v1402_v42, 0.0  ;;  %v1394_v46 = vadd.f32 %v1580_v29, %v1393_v59 }
 0x6c5   : > { %v1677_v51 = vpop.f32.mrf.mxu1 }
 0x6c6   : > { %v1421_v52 = vmul.f32 %v1587_v43, %v1410_v44  ;;  %v1408_v37 = vmax.f32 %v1394_v46, 0.0  ;;  %v1405_v15 = vadd.f32 %v1677_v51, %v1580_v29 }
 0x6c7   : > { %v1396_v19 = vpop.f32.mrf.mxu1 }
 0x6c8   : > { %v1432_v17 = vadd.f32 %v1588_v48, %v1421_v52  ;;  %v1419_v58 = vmul.f32 %v1587_v43, %v1408_v37  ;;  %v1411_v21 = vmax.f32 %v1405_v15, 0.0  ;;  %v1397_v36 = vadd.f32 %v1580_v29, %v1396_v19 }
 0x6ca   : > { %1436 = vst [vmem:[%s536_s23 + $0x10] sm:$0xff] %v1432_v17  ;;  %v1430_v50 = vadd.f32 %v1588_v48, %v1419_v58  ;;  %v1422_v54 = vmul.f32 %v1587_v43, %v1411_v21  ;;  %v1409_v23 = vmax.f32 %v1397_v36, 0.0 }
 0x6cc   : > { %1434 = vst [vmem:[%s536_s23] sm:$0xff] %v1430_v50  ;;  %v1433_v25 = vadd.f32 %v1588_v48, %v1422_v54  ;;  %v1420_v56 = vmul.f32 %v1587_v43, %v1409_v23 }
 0x6ce   : > { %1437 = vst [vmem:[%s536_s23 + $0x18] sm:$0xff] %v1433_v25  ;;  %v1431_v24 = vadd.f32 %v1588_v48, %v1420_v56 }
 0x6d0   : > { %1435 = vst [vmem:[%s536_s23 + $0x8] sm:$0xff] %v1431_v24 }
 0x6d1   : > { %1773 = shalt.err (!%p1770_p3)
}
 0x6d2   : > { %s1774_s2 = scalar_lea.hbm %s2249_s17, 512  ;;  %s1778_s16 = scalar_lea.hbm %s2310_s15, 1536 }
 0x6d3   : > { %p1775_p4 = scmp.ne.s32.totalorder %s2249_s17, %s1774_s2  ;;  %p1779_p9 = scmp.lt.s32.totalorder %s2249_s17, %s2310_s15 }
 0x6d4   : > { %p1780_p10 = scmp.lt.s32.totalorder %s1778_s16, %s1774_s2 }
 0x6d5   : > { %p1776_p7 = pnand %p1775_p4, %p1944_p5 }
 0x6d6   : > { %p1781_p11 = por %p1780_p10, %p1779_p9 }
 0x6d7   : > { %p1777_p8 = pneg %p1776_p7 }
 0x6d9   : > { %p1782_p12 = pnand %p1781_p11, %p1777_p8 }
 0x6db   : > { %1785 = shalt.err (!%p1782_p12)
}
 0x6dc   : > { %s1824_s22 = smov 128   ;;  %s1825_s27 = smov 8  }
 0x6dd   : > { %1678 = dma.vmem_to_hbm [thread:$0]  (%p1944_p5), %s2251_s26, 512, %s2249_s17, %s2255_s25, %s1824_s22, %s1824_s22, %s1825_s27  }
 0x6de PF: > { %p1684_p13 = scmp.ge.s32.totalorder %s1820_s21, 2  ;;  %s1467_s3 = sand.u32 1, %s1808_s18  }
 0x6df   : > { %s1468_s0 = scalar_lea.sflag [#allocation3], %s1467_s3 }
 0x6e0   : > { %p1681_p0 = pnand %p1684_p13, %p1948_p6 }
 0x6e2   : > { %p1682_p1 = pneg %p1681_p0 }
 0x6e4   : > { %1803 = dma.done.wait (%p1682_p1), %s1468_s0, 512  }
 0x6e5   : > { %1805 = vsyncadd (%p1682_p1), %s1468_s0, 4294966784  ;;  %s2338_s2 = sld [smem:[#allocation5_spill]]  ;;  %p25_p2 = scmp.ge.s32.totalorder %s1931_s24, 5  }
 0x6e6   : > { %s2339_s18 = smov %s1812_s19  ;;  %s2340_s19 = smov %s1816_s20 }
 0x6e7   : > { %s2342_s21 = smov %s1931_s24  ;;  %27 = sbr.rel (!%p25_p2) target bundleno = 8 (0x8), region = 124 }
 0x6eb   : > { %s2341_s20 = smov %s2338_s2 }
 0x6ec   :  { %1473 = vsyncpa [#allocation3], 1 }
 0x6ed   :  { %1475 = vsyncpa [#allocation3 + $0x1], 1 }

</bundles_post_ra>
